<compile_context>
chip_gen: v6e
topology: v6e:2x2x1
jax: 0.10.0
libtpu: 0.0.40
codegen_flags: <defaults>
</compile_context>

<pallas_src>
import numpy as np
import jax
import jax.numpy as jnp
from jax.experimental import pallas as pl
from jax.experimental.pallas import tpu as pltpu


def _round_up(x, m):
    return (x + m - 1) // m * m


def _ae_kernel(x_ref, we_ref, be_ref, wd_ref, bd_ref, xout_ref, zout_ref):
    # Cast the batch tile in-kernel (free VPU work hidden under the matmuls).
    x = x_ref[...].astype(we_ref.dtype)
    # Encoder: z = x @ We + be   (bf16 operands, f32 accumulation on the MXU)
    z = jnp.dot(x, we_ref[...], preferred_element_type=jnp.float32)
    z = z + be_ref[...]                      # (1, Hp) broadcasts over the batch tile
    zout_ref[...] = z.astype(zout_ref.dtype)
    # Decoder: x_pred = z @ Wd + bd
    xp = jnp.dot(z.astype(wd_ref.dtype), wd_ref[...],
                 preferred_element_type=jnp.float32)
    xp = xp + bd_ref[...]                    # (1, Dp) broadcasts over the batch tile
    xout_ref[...] = xp.astype(xout_ref.dtype)


def prepare_params(w_enc, b_enc, w_dec, b_dec, *, compute_dtype=jnp.bfloat16):
    """One-time parameter prep: lane-align (pad to 128) and cast the weights.

    w_enc: [D, H], b_enc: [H], w_dec: [H, D], b_dec: [D]  (already [in, out]).
    Zero padding of weight rows/cols and bias entries keeps the valid region of the
    outputs exact (padded hidden lanes contribute exactly 0 to the decoder matmul).
    """
    D, H = w_enc.shape
    Dp, Hp = _round_up(D, 128), _round_up(H, 128)
    we = jnp.zeros((Dp, Hp), compute_dtype).at[:D, :H].set(w_enc.astype(compute_dtype))
    wd = jnp.zeros((Hp, Dp), compute_dtype).at[:H, :D].set(w_dec.astype(compute_dtype))
    be = jnp.zeros((1, Hp), jnp.float32).at[0, :H].set(b_enc.astype(jnp.float32))
    bd = jnp.zeros((1, Dp), jnp.float32).at[0, :D].set(b_dec.astype(jnp.float32))
    return {"we": we, "be": be, "wd": wd, "bd": bd,
            "D": D, "H": H, "Dp": Dp, "Hp": Hp, "compute_dtype": compute_dtype}


def autoencoder_forward(x, params, *, out_dtype=None, max_batch_tile=1024):
    """x: [B, D]; params from prepare_params().  Returns (x_pred [B, D], z_pred [B, H])."""
    B, D = x.shape
    assert D == params["D"], "x feature dim does not match prepared params"
    H, Dp, Hp = params["H"], params["Dp"], params["Hp"]
    cdt = params["compute_dtype"]
    out_dtype = x.dtype if out_dtype is None else out_dtype

    c_item = np.dtype(cdt).itemsize
    o_item = np.dtype(out_dtype).itemsize

    # x only needs a wrapper-side pad/cast when its feature dim is not 128-aligned
    # (small-D case).  Otherwise it is streamed as-is and cast inside the kernel.
    if D != Dp:
        x_in = jnp.zeros((B, Dp), cdt).at[:, :D].set(x.astype(cdt))
    else:
        x_in = x
    xin_item = np.dtype(x_in.dtype).itemsize

    # Generation-aware VMEM budget (v7x = 64 MiB, v5e/v6e = 128 MiB).
    try:
        vmem_cap = int(pltpu.get_tpu_info().vmem_capacity_bytes)
    except Exception:
        vmem_cap = 64 * 1024 * 1024
    headroom = 8 * 1024 * 1024

    weight_bytes = 2 * Dp * Hp * c_item            # single-buffered (constant index_map)
    bias_bytes = (Hp + Dp) * 4
    act_budget = max(vmem_cap - headroom - weight_bytes - bias_bytes, 8 * 1024 * 1024)
    # TODO(synk): when the (single-buffered) weights alone exceed ~48 MiB (very large
    # D*H on v7x), switch to a K-tiled reduction grid axis (last, "arbitrary") with an
    # f32 VMEM accumulator instead of keeping full weights resident.

    def tile_bytes(tb):  # double-buffered x tile + both double-buffered output tiles
        return 2 * tb * (Dp * xin_item + (Dp + Hp) * o_item)

    # Batch tile: sublane-aligned (8), as large as the activation budget allows, but
    # split into >= 2 grid steps when the batch permits so v7x megacore can shard.
    TB = min(max_batch_tile, _round_up(B, 8))
    if B >= 16:
        TB = min(TB, _round_up(pl.cdiv(B, 2), 8))
    while TB > 8 and tile_bytes(TB) > act_budget:
        TB = max(8, _round_up(TB // 2, 8))
    n_tiles = pl.cdiv(B, TB)   # partial last tile: rows independent, boundary stores masked

    # vmem_limit: budget 2x weights so the non-Buffered fallback also fits, but never
    # exceed physical capacity minus headroom, and never go below the 32 MiB default.
    vmem_needed = 2 * weight_bytes + 2 * bias_bytes + tile_bytes(TB) + (2 << 20)
    vmem_limit = int(min(max(vmem_needed, 32 * 1024 * 1024), vmem_cap - (4 << 20)))

    cost = pl.CostEstimate(
        flops=2 * B * (Dp * Hp + Hp * Dp),
        transcendentals=0,
        bytes_accessed=(B * Dp * xin_item + weight_bytes + bias_bytes
                        + B * (Dp + Hp) * o_item),
    )

    def _run(single_buffer_weights):
        wkw = ({"pipeline_mode": pl.Buffered(1)} if single_buffer_weights else {})
        return pl.pallas_call(
            _ae_kernel,
            out_shape=(
                jax.ShapeDtypeStruct((B, Dp), out_dtype),   # x_pred (feature-padded)
                jax.ShapeDtypeStruct((B, Hp), out_dtype),   # z_pred (feature-padded)
            ),
            grid_spec=pl.GridSpec(
                grid=(n_tiles,),
                in_specs=[
                    pl.BlockSpec((TB, Dp), lambda i: (i, 0)),            # x (batch-tiled)
                    pl.BlockSpec((Dp, Hp), lambda i: (0, 0), **wkw),     # w_enc (resident)
                    pl.BlockSpec((1, Hp), lambda i: (0, 0), **wkw),      # b_enc
                    pl.BlockSpec((Hp, Dp), lambda i: (0, 0), **wkw),     # w_dec (resident)
                    pl.BlockSpec((1, Dp), lambda i: (0, 0), **wkw),      # b_dec
                ],
                out_specs=(
                    pl.BlockSpec((TB, Dp), lambda i: (i, 0)),
                    pl.BlockSpec((TB, Hp), lambda i: (i, 0)),
                ),
            ),
            compiler_params=pltpu.CompilerParams(
                dimension_semantics=("parallel",),
                vmem_limit_bytes=vmem_limit,
            ),
            cost_estimate=cost,
        )(x_in, params["we"], params["be"], params["wd"], params["bd"])

    try:
        x_pred_p, z_pred_p = _run(True)
    except Exception:
        # Buffered(1) not supported on this jax build -> default double-buffering.
        x_pred_p, z_pred_p = _run(False)

    # Strip feature padding (batch dim was never padded).
    x_pred = x_pred_p if Dp == D else x_pred_p[:, :D]
    z_pred = z_pred_p if Hp == H else z_pred_p[:, :H]
    return x_pred, z_pred


if __name__ == "__main__":
    # Small shapes consistent with the forward: batch=8, in_dim=64, hidden=32.
    B, D, H = 8, 64, 32
    key = jax.random.PRNGKey(0)
    kx, k1, k2, k3, k4 = jax.random.split(key, 5)

    x = jax.random.normal(kx, (B, D), dtype=jnp.float32)

    # PyTorch-style uniform init (bound = 1/sqrt(fan_in)), stored as [in, out]
    # (already transposed relative to nn.Linear.weight).
    bound_e = 1.0 / (D ** 0.5)
    bound_d = 1.0 / (H ** 0.5)
    w_enc = jax.random.uniform(k1, (D, H), jnp.float32, -bound_e, bound_e)
    b_enc = jax.random.uniform(k2, (H,), jnp.float32, -bound_e, bound_e)
    w_dec = jax.random.uniform(k3, (H, D), jnp.float32, -bound_d, bound_d)
    b_dec = jax.random.uniform(k4, (D,), jnp.float32, -bound_d, bound_d)

    # Parameter prep happens once (hoisted out of the per-call forward path).
    params = prepare_params(w_enc, b_enc, w_dec, b_dec)

    x_pred, z_pred = autoencoder_forward(x, params)
    jax.block_until_ready((x_pred, z_pred))

    # Reference check in plain JAX f32 (same math as the PyTorch forward).
    # Kernel uses bf16 operands with f32 accumulation, so allow bf16-level error.
    z_ref = x @ w_enc + b_enc
    x_ref = z_ref @ w_dec + b_dec
    assert x_pred.shape == (B, D) and z_pred.shape == (B, H)
    assert jnp.allclose(z_pred, z_ref, atol=3e-2, rtol=3e-2)
    assert jnp.allclose(x_pred, x_ref, atol=3e-2, rtol=3e-2)

    print("KERNEL_OK")
</pallas_src>

<mosaic_0001>
module attributes {stable_mosaic.version = 11 : i64} {
  func.func @_ae_kernel(%arg0: i32, %arg1: memref<8x128xbf16, #tpu.memory_space<vmem>>, %arg2: memref<128x128xbf16, #tpu.memory_space<vmem>>, %arg3: memref<1x128xf32, #tpu.memory_space<vmem>>, %arg4: memref<128x128xbf16, #tpu.memory_space<vmem>>, %arg5: memref<1x128xf32, #tpu.memory_space<vmem>>, %arg6: memref<8x128xf32, #tpu.memory_space<vmem>>, %arg7: memref<8x128xf32, #tpu.memory_space<vmem>>) attributes {dimension_semantics = [#tpu.dimension_semantics<parallel>], iteration_bounds = array<i64: 1>, scalar_prefetch = 0 : i64, scratch_operands = 0 : i64, tpu.core_type = #tpu.core_type<tc>, window_params = [{transform_indices = @transform_0, window_bounds = array<i64: 8, 128>}, {pipeline_mode = #tpu.pipeline_mode<synchronous>, transform_indices = @transform_1, window_bounds = array<i64: 128, 128>}, {pipeline_mode = #tpu.pipeline_mode<synchronous>, transform_indices = @transform_2, window_bounds = array<i64: 1, 128>}, {pipeline_mode = #tpu.pipeline_mode<synchronous>, transform_indices = @transform_3, window_bounds = array<i64: 128, 128>}, {pipeline_mode = #tpu.pipeline_mode<synchronous>, transform_indices = @transform_4, window_bounds = array<i64: 1, 128>}, {transform_indices = @transform_5, window_bounds = array<i64: 8, 128>}, {transform_indices = @transform_6, window_bounds = array<i64: 8, 128>}]} {
    %c0 = arith.constant 0 : index
    %c0_0 = arith.constant 0 : index
    %0 = vector.load %arg1[%c0, %c0_0] : memref<8x128xbf16, #tpu.memory_space<vmem>>, vector<8x128xbf16>
    %c0_1 = arith.constant 0 : index
    %c0_2 = arith.constant 0 : index
    %1 = vector.load %arg2[%c0_1, %c0_2] : memref<128x128xbf16, #tpu.memory_space<vmem>>, vector<128x128xbf16>
    %cst = arith.constant dense<0.000000e+00> : vector<8x128xf32>
    %2 = tpu.matmul %0, %1, %cst {dimension_numbers = #tpu.dot_dimension_numbers<[1], [0], [0], [1], [0, 0, 1, 1], [], []>} : vector<8x128xbf16>, vector<128x128xbf16>, vector<8x128xf32> -> vector<8x128xf32>
    %c0_3 = arith.constant 0 : index
    %c0_4 = arith.constant 0 : index
    %3 = vector.load %arg3[%c0_3, %c0_4] : memref<1x128xf32, #tpu.memory_space<vmem>>, vector<1x128xf32>
    %4 = vector.broadcast %3 : vector<1x128xf32> to vector<8x128xf32>
    %5 = arith.addf %2, %4 : vector<8x128xf32>
    %c0_5 = arith.constant 0 : index
    %c0_6 = arith.constant 0 : index
    %6 = vector.load %arg7[%c0_5, %c0_6] : memref<8x128xf32, #tpu.memory_space<vmem>>, vector<8x128xf32>
    tpu.vector_store %arg7[%c0_5, %c0_6], %5 {strides = array<i32>} : memref<8x128xf32, #tpu.memory_space<vmem>>, vector<8x128xf32>,
    %7 = arith.truncf %5 : vector<8x128xf32> to vector<8x128xbf16>
    %c0_7 = arith.constant 0 : index
    %c0_8 = arith.constant 0 : index
    %8 = vector.load %arg4[%c0_7, %c0_8] : memref<128x128xbf16, #tpu.memory_space<vmem>>, vector<128x128xbf16>
    %cst_9 = arith.constant dense<0.000000e+00> : vector<8x128xf32>
    %9 = tpu.matmul %7, %8, %cst_9 {dimension_numbers = #tpu.dot_dimension_numbers<[1], [0], [0], [1], [0, 0, 1, 1], [], []>} : vector<8x128xbf16>, vector<128x128xbf16>, vector<8x128xf32> -> vector<8x128xf32>
    %c0_10 = arith.constant 0 : index
    %c0_11 = arith.constant 0 : index
    %10 = vector.load %arg5[%c0_10, %c0_11] : memref<1x128xf32, #tpu.memory_space<vmem>>, vector<1x128xf32>
    %11 = vector.broadcast %10 : vector<1x128xf32> to vector<8x128xf32>
    %12 = arith.addf %9, %11 : vector<8x128xf32>
    %c0_12 = arith.constant 0 : index
    %c0_13 = arith.constant 0 : index
    %13 = vector.load %arg6[%c0_12, %c0_13] : memref<8x128xf32, #tpu.memory_space<vmem>>, vector<8x128xf32>
    tpu.vector_store %arg6[%c0_12, %c0_13], %12 {strides = array<i32>} : memref<8x128xf32, #tpu.memory_space<vmem>>, vector<8x128xf32>,
    return
  }
  func.func @transform_0(%arg0: i32) -> (i32, i32) {
    %c0_i32 = arith.constant 0 : i32
    %c0_i32_0 = arith.constant 0 : i32
    return %arg0, %c0_i32 : i32, i32
  }
  func.func @transform_1(%arg0: i32) -> (i32, i32) {
    %c0_i32 = arith.constant 0 : i32
    %c0_i32_0 = arith.constant 0 : i32
    %c0_i32_1 = arith.constant 0 : i32
    return %c0_i32, %c0_i32_0 : i32, i32
  }
  func.func @transform_2(%arg0: i32) -> (i32, i32) {
    %c0_i32 = arith.constant 0 : i32
    %c0_i32_0 = arith.constant 0 : i32
    %c0_i32_1 = arith.constant 0 : i32
    return %c0_i32, %c0_i32_0 : i32, i32
  }
  func.func @transform_3(%arg0: i32) -> (i32, i32) {
    %c0_i32 = arith.constant 0 : i32
    %c0_i32_0 = arith.constant 0 : i32
    %c0_i32_1 = arith.constant 0 : i32
    return %c0_i32, %c0_i32_0 : i32, i32
  }
  func.func @transform_4(%arg0: i32) -> (i32, i32) {
    %c0_i32 = arith.constant 0 : i32
    %c0_i32_0 = arith.constant 0 : i32
    %c0_i32_1 = arith.constant 0 : i32
    return %c0_i32, %c0_i32_0 : i32, i32
  }
  func.func @transform_5(%arg0: i32) -> (i32, i32) {
    %c0_i32 = arith.constant 0 : i32
    %c0_i32_0 = arith.constant 0 : i32
    return %arg0, %c0_i32 : i32, i32
  }
  func.func @transform_6(%arg0: i32) -> (i32, i32) {
    %c0_i32 = arith.constant 0 : i32
    %c0_i32_0 = arith.constant 0 : i32
    return %arg0, %c0_i32 : i32, i32
  }
}

module attributes {stable_mosaic.version = 11 : i64} {
  func.func @_ae_kernel(%arg0: i32, %arg1: memref<8x128xbf16, #tpu.memory_space<vmem>>, %arg2: memref<128x128xbf16, #tpu.memory_space<vmem>>, %arg3: memref<1x128xf32, #tpu.memory_space<vmem>>, %arg4: memref<128x128xbf16, #tpu.memory_space<vmem>>, %arg5: memref<1x128xf32, #tpu.memory_space<vmem>>, %arg6: memref<8x128xf32, #tpu.memory_space<vmem>>, %arg7: memref<8x128xf32, #tpu.memory_space<vmem>>) attributes {dimension_semantics = [#tpu.dimension_semantics<parallel>], iteration_bounds = array<i64: 1>, scalar_prefetch = 0 : i64, scratch_operands = 0 : i64, tpu.core_type = #tpu.core_type<tc>, window_params = [{transform_indices = @transform_0, window_bounds = array<i64: 8, 128>}, {pipeline_mode = #tpu.pipeline_mode<synchronous>, transform_indices = @transform_1, window_bounds = array<i64: 128, 128>}, {pipeline_mode = #tpu.pipeline_mode<synchronous>, transform_indices = @transform_2, window_bounds = array<i64: 1, 128>}, {pipeline_mode = #tpu.pipeline_mode<synchronous>, transform_indices = @transform_3, window_bounds = array<i64: 128, 128>}, {pipeline_mode = #tpu.pipeline_mode<synchronous>, transform_indices = @transform_4, window_bounds = array<i64: 1, 128>}, {transform_indices = @transform_5, window_bounds = array<i64: 8, 128>}, {transform_indices = @transform_6, window_bounds = array<i64: 8, 128>}]} {
    %c0 = arith.constant 0 : index
    %c0_0 = arith.constant 0 : index
    %0 = vector.load %arg1[%c0, %c0_0] : memref<8x128xbf16, #tpu.memory_space<vmem>>, vector<8x128xbf16>
    %c0_1 = arith.constant 0 : index
    %c0_2 = arith.constant 0 : index
    %1 = vector.load %arg2[%c0_1, %c0_2] : memref<128x128xbf16, #tpu.memory_space<vmem>>, vector<128x128xbf16>
    %cst = arith.constant dense<0.000000e+00> : vector<8x128xf32>
    %2 = tpu.matmul %0, %1, %cst {dimension_numbers = #tpu.dot_dimension_numbers<[1], [0], [0], [1], [0, 0, 1, 1], [], []>} : vector<8x128xbf16>, vector<128x128xbf16>, vector<8x128xf32> -> vector<8x128xf32>
    %c0_3 = arith.constant 0 : index
    %c0_4 = arith.constant 0 : index
    %3 = vector.load %arg3[%c0_3, %c0_4] : memref<1x128xf32, #tpu.memory_space<vmem>>, vector<1x128xf32>
    %4 = vector.broadcast %3 : vector<1x128xf32> to vector<8x128xf32>
    %5 = arith.addf %2, %4 : vector<8x128xf32>
    %c0_5 = arith.constant 0 : index
    %c0_6 = arith.constant 0 : index
    %6 = vector.load %arg7[%c0_5, %c0_6] : memref<8x128xf32, #tpu.memory_space<vmem>>, vector<8x128xf32>
    tpu.vector_store %arg7[%c0_5, %c0_6], %5 {strides = array<i32>} : memref<8x128xf32, #tpu.memory_space<vmem>>, vector<8x128xf32>,
    %7 = arith.truncf %5 : vector<8x128xf32> to vector<8x128xbf16>
    %c0_7 = arith.constant 0 : index
    %c0_8 = arith.constant 0 : index
    %8 = vector.load %arg4[%c0_7, %c0_8] : memref<128x128xbf16, #tpu.memory_space<vmem>>, vector<128x128xbf16>
    %cst_9 = arith.constant dense<0.000000e+00> : vector<8x128xf32>
    %9 = tpu.matmul %7, %8, %cst_9 {dimension_numbers = #tpu.dot_dimension_numbers<[1], [0], [0], [1], [0, 0, 1, 1], [], []>} : vector<8x128xbf16>, vector<128x128xbf16>, vector<8x128xf32> -> vector<8x128xf32>
    %c0_10 = arith.constant 0 : index
    %c0_11 = arith.constant 0 : index
    %10 = vector.load %arg5[%c0_10, %c0_11] : memref<1x128xf32, #tpu.memory_space<vmem>>, vector<1x128xf32>
    %11 = vector.broadcast %10 : vector<1x128xf32> to vector<8x128xf32>
    %12 = arith.addf %9, %11 : vector<8x128xf32>
    %c0_12 = arith.constant 0 : index
    %c0_13 = arith.constant 0 : index
    %13 = vector.load %arg6[%c0_12, %c0_13] : memref<8x128xf32, #tpu.memory_space<vmem>>, vector<8x128xf32>
    tpu.vector_store %arg6[%c0_12, %c0_13], %12 {strides = array<i32>} : memref<8x128xf32, #tpu.memory_space<vmem>>, vector<8x128xf32>,
    return
  }
  func.func @transform_0(%arg0: i32) -> (i32, i32) {
    %c0_i32 = arith.constant 0 : i32
    %c0_i32_0 = arith.constant 0 : i32
    return %arg0, %c0_i32 : i32, i32
  }
  func.func @transform_1(%arg0: i32) -> (i32, i32) {
    %c0_i32 = arith.constant 0 : i32
    %c0_i32_0 = arith.constant 0 : i32
    %c0_i32_1 = arith.constant 0 : i32
    return %c0_i32, %c0_i32_0 : i32, i32
  }
  func.func @transform_2(%arg0: i32) -> (i32, i32) {
    %c0_i32 = arith.constant 0 : i32
    %c0_i32_0 = arith.constant 0 : i32
    %c0_i32_1 = arith.constant 0 : i32
    return %c0_i32, %c0_i32_0 : i32, i32
  }
  func.func @transform_3(%arg0: i32) -> (i32, i32) {
    %c0_i32 = arith.constant 0 : i32
    %c0_i32_0 = arith.constant 0 : i32
    %c0_i32_1 = arith.constant 0 : i32
    return %c0_i32, %c0_i32_0 : i32, i32
  }
  func.func @transform_4(%arg0: i32) -> (i32, i32) {
    %c0_i32 = arith.constant 0 : i32
    %c0_i32_0 = arith.constant 0 : i32
    %c0_i32_1 = arith.constant 0 : i32
    return %c0_i32, %c0_i32_0 : i32, i32
  }
  func.func @transform_5(%arg0: i32) -> (i32, i32) {
    %c0_i32 = arith.constant 0 : i32
    %c0_i32_0 = arith.constant 0 : i32
    return %arg0, %c0_i32 : i32, i32
  }
  func.func @transform_6(%arg0: i32) -> (i32, i32) {
    %c0_i32 = arith.constant 0 : i32
    %c0_i32_0 = arith.constant 0 : i32
    return %arg0, %c0_i32 : i32, i32
  }
}

</mosaic_0001>

<bundles_post_ra>
// kernel: tpu_custom_call.1
= control target key start
LH: loop header
LB: loop body
LE: loop exit
PB: predicated region body
PF: predicated region fallthrough
CT: control target
= control target key end

     0   :  { %12 = vsyncpa [#allocation3], 0  ;;  %s594_s0 = inlined_call_operand.hbm [shape: bf16[8,128], index: 0, kind: input, shape index: {}]   ;;  %s595_s1 = inlined_call_operand.hbm [shape: bf16[128,128], index: 1, kind: input, shape index: {}]   ;;  %s596_s2 = inlined_call_operand.vmem [shape: f32[1,128], index: 2, kind: input, shape index: {}]   ;;  %s597_s3 = inlined_call_operand.hbm [shape: bf16[128,128], index: 3, kind: input, shape index: {}]   ;;  %s598_s4 = inlined_call_operand.vmem [shape: f32[1,128], index: 4, kind: input, shape index: {}]   ;;  %s599_s5 = inlined_call_operand.hbm [shape: f32[8,128], index: 5, kind: output, shape index: {0}]   ;;  %s600_s6 = inlined_call_operand.hbm [shape: f32[8,128], index: 6, kind: output, shape index: {1}]  }
   0x1   :  { %13 = vsyncpa [#allocation6], 0 }
   0x2   :  { %14 = vsyncpa [#allocation4], 0 }
   0x3   :  { %15 = vsyncpa [#allocation10], 0  ;;  %s529_s21 = smov [#allocation5]  }
   0x4   :  { %s31_s22 = sshll.u32 %s529_s21, 4  ;;  %s32_s22 = int_to_ptr.vmem [resolvable:$true] %s31_s22 }
   0x5   :  { %s429_s23 = scalar_lea.vmem %s32_s22, 1024  ;;  %p434_p1 = scmp.lt.s32.totalorder %s32_s22, %s32_s22 }
   0x6   :  { %p430_p0 = scmp.ne.s32.totalorder %s32_s22, %s429_s23  ;;  %p435_p2 = scmp.lt.s32.totalorder %s429_s23, %s429_s23 }
   0x8   :  { %p436_p3 = por %p435_p2, %p434_p1 }
   0xa   :  { %p437_p4 = pnand %p436_p3, %p430_p0 }
   0xc   :  { %440 = shalt.err (!%p437_p4)
}
   0xd   :  { %s530_s24 = smov 64   ;;  %s531_s25 = smov 4  }
   0xe   :  { %37 = dma.hbm_to_vmem [thread:$0]  %s595_s1, 1024, %s32_s22, [#allocation6], %s530_s24, %s530_s24, %s531_s25  }
   0xf   :  { %s532_s28 = smov [#allocation2]   ;;  %s533_s30 = smov [#allocation7]  }
  0x10   :  { %s22_s29 = sshll.u32 %s532_s28, 4  ;;  %s45_s7 = sshll.u32 %s533_s30, 4  ;;  %s23_s29 = int_to_ptr.vmem [resolvable:$true] %s22_s29  ;;  %s46_s7 = int_to_ptr.vmem [resolvable:$true] %s45_s7 }
  0x11   :  { %s449_s8 = scalar_lea.vmem %s23_s29, 64  ;;  %p454_p6 = scmp.lt.s32.totalorder %s23_s29, %s23_s29 }
  0x12   :  { %p450_p5 = scmp.ne.s32.totalorder %s23_s29, %s449_s8  ;;  %p455_p7 = scmp.lt.s32.totalorder %s449_s8, %s449_s8 }
  0x14   :  { %p456_p8 = por %p455_p7, %p454_p6 }
  0x16   :  { %p457_p9 = pnand %p456_p8, %p450_p5 }
  0x18   :  { %460 = shalt.err (!%p457_p9)
}
  0x19   :  { %25 = dma.hbm_to_vmem [thread:$0]  %s594_s0, 64, %s23_s29, [#allocation3]  }
  0x1a   :  { %s469_s11 = scalar_lea.vmem %s46_s7, 1024  ;;  %p474_p11 = scmp.lt.s32.totalorder %s46_s7, %s46_s7 }
  0x1b   :  { %p470_p10 = scmp.ne.s32.totalorder %s46_s7, %s469_s11  ;;  %p475_p12 = scmp.lt.s32.totalorder %s469_s11, %s469_s11 }
  0x1d   :  { %p476_p13 = por %p475_p12, %p474_p11 }
  0x1f   :  { %p477_p0 = pnand %p476_p13, %p470_p10 }
  0x21   :  { %480 = shalt.err (!%p477_p0)
}
  0x22   :  { %51 = dma.hbm_to_vmem [thread:$0]  %s597_s3, 1024, %s46_s7, [#allocation6], %s530_s24, %s530_s24, %s531_s25  }
  0x23   :  { %521 = dma.done.wait [#allocation3], 64  }
  0x24   :  { %522 = vsyncadd [#allocation3], 4294967232 }
  0x25   :  { %523 = dma.done.wait [#allocation6], 2048  }
  0x26   :  { %524 = vsyncadd [#allocation6], 4294965248  ;;  %v534_v0 = vmov 0.0   ;;  %vm535_vm0 = vmmov 0   ;;  %v405_v1 = vld [vmem:[#allocation5 + $0x38] sm:$0xff]   ;;  %v406_v2 = vld [vmem:[#allocation5 + $0x30] sm:$0xff]  }
  0x27   :  { %356 = vmatprep.subr.bf16.mxu0 %v534_v0  ;;  %372 = vmatprep.mubr.msk.bf16.mxu0 %vm535_vm0, %v534_v0  ;;  %v407_v3 = vld [vmem:[#allocation5 + $0x28] sm:$0xff]   ;;  %v413_v4 = vld [vmem:[#allocation7 + $0x38] sm:$0xff]   ;;  %v408_v5 = vld [vmem:[#allocation5 + $0x20] sm:$0xff]   ;;  %s536_s13 = smov [#allocation9]  }
  0x28   :  { %376 = vmatprep.subr.bf16.mxu1 %v534_v0  ;;  %392 = vmatprep.mubr.msk.bf16.mxu1 %vm535_vm0, %v534_v0  ;;  %v414_v6 = vld [vmem:[#allocation7 + $0x30] sm:$0xff]   ;;  %v409_v7 = vld [vmem:[#allocation5 + $0x18] sm:$0xff]   ;;  %v415_v8 = vld [vmem:[#allocation7 + $0x28] sm:$0xff]   ;;  %s306_s14 = sshll.u32 %s536_s13, 4  ;;  %s307_s14 = int_to_ptr.vmem [resolvable:$true] %s306_s14 }
  0x29   :  { %357 = vmatpush3.bf16.msra.mxu0 %v405_v1  ;;  %377 = vmatpush3.bf16.msra.mxu1 %v413_v4  ;;  %v410_v9 = vld [vmem:[#allocation5 + $0x10] sm:$0xff]   ;;  %v416_v10 = vld [vmem:[#allocation7 + $0x20] sm:$0xff]   ;;  %v411_v11 = vld [vmem:[#allocation5 + $0x8] sm:$0xff]   ;;  %s481_s15 = scalar_lea.vmem %s307_s14, 128  ;;  %p486_p2 = scmp.lt.s32.totalorder %s307_s14, %s307_s14 }
  0x2a   :  { %358 = vmatprep.subr.bf16.mxu0 %v534_v0  ;;  %378 = vmatprep.subr.bf16.mxu1 %v534_v0  ;;  %v417_v12 = vld [vmem:[#allocation7 + $0x18] sm:$0xff]   ;;  %v412_v13 = vld [vmem:[#allocation5] sm:$0xff]   ;;  %v418_v14 = vld [vmem:[#allocation7 + $0x10] sm:$0xff]   ;;  %p482_p1 = scmp.ne.s32.totalorder %s307_s14, %s481_s15  ;;  %p487_p3 = scmp.lt.s32.totalorder %s481_s15, %s481_s15 }
  0x2b   :  { %v64_v15 = vld [vmem:[#allocation2] sm:$0xf]  ;;  %v419_v16 = vld [vmem:[#allocation7 + $0x8] sm:$0xff]   ;;  %v420_v17 = vld [vmem:[#allocation7] sm:$0xff]  }
  0x2c   :  { %v320_v18 = vld [vmem:[%s596_s2] ss:$0 sm:$0xff]  ;;  %p488_p4 = por %p487_p3, %p486_p2 }
  0x2d   :  { %359 = vmatpush3.bf16.msra.mxu0 %v406_v2  ;;  %379 = vmatpush3.bf16.msra.mxu1 %v414_v6 }
  0x2e   :  { %360 = vmatprep.subr.bf16.mxu0 %v534_v0  ;;  %380 = vmatprep.subr.bf16.mxu1 %v534_v0  ;;  %p489_p5 = pnand %p488_p4, %p482_p1 }
  0x31   :  { %361 = vmatpush3.bf16.msra.mxu0 %v407_v3  ;;  %381 = vmatpush3.bf16.msra.mxu1 %v415_v8 }
  0x32   :  { %362 = vmatprep.subr.bf16.mxu0 %v534_v0  ;;  %382 = vmatprep.subr.bf16.mxu1 %v534_v0 }
  0x35   :  { %363 = vmatpush3.bf16.msra.mxu0 %v408_v5  ;;  %383 = vmatpush3.bf16.msra.mxu1 %v416_v10 }
  0x36   :  { %364 = vmatprep.subr.bf16.mxu0 %v534_v0  ;;  %384 = vmatprep.subr.bf16.mxu1 %v534_v0 }
  0x39   :  { %365 = vmatpush3.bf16.msra.mxu0 %v409_v7  ;;  %385 = vmatpush3.bf16.msra.mxu1 %v417_v12 }
  0x3a   :  { %366 = vmatprep.subr.bf16.mxu0 %v534_v0  ;;  %386 = vmatprep.subr.bf16.mxu1 %v534_v0 }
  0x3d   :  { %367 = vmatpush3.bf16.msra.mxu0 %v410_v9  ;;  %387 = vmatpush3.bf16.msra.mxu1 %v418_v14 }
  0x3e   :  { %368 = vmatprep.subr.bf16.mxu0 %v534_v0  ;;  %388 = vmatprep.subr.bf16.mxu1 %v534_v0 }
  0x41   :  { %369 = vmatpush3.bf16.msra.mxu0 %v411_v11  ;;  %389 = vmatpush3.bf16.msra.mxu1 %v419_v16 }
  0x42   :  { %370 = vmatprep.subr.bf16.mxu0 %v534_v0  ;;  %390 = vmatprep.subr.bf16.mxu1 %v534_v0 }
  0x45   :  { %371 = vmatpush3.bf16.msra.mxu0 %v412_v13  ;;  %391 = vmatpush3.bf16.msra.mxu1 %v420_v17 }
  0x48   :  { %373 = vmatmul.mubr.bf16.vlgmr.msra.gmra.mxu0 %v64_v15 }
 0x108   :  { %v170_v19 = vpop.f32.mrf.mxu0 }
 0x109   :  { %v171_v20 = vadd.f32 %v320_v18, %v170_v19 }
 0x10a   :  { %v374_v21 = vpop.f32.mrf.mxu0 }
 0x10b   :  { %v177_v22 = vpack.c.bf16 %v171_v20, %v171_v20  ;;  %176 = vst [vmem:[#allocation9] sm:$0xff] %v171_v20 }
 0x10c   :  { %v173_v23 = vpop.f32.mrf.mxu0 }
 0x10d   :  { %393 = vmatmul.mubr.bf16.vlgmr.msra.gmra.mxu1 %v177_v22 }
 0x10e   :  { %v375_v24 = vpop.f32.mrf.mxu0 }
 0x10f   :  { %492 = shalt.err (!%p489_p5)
}
 0x110   :  { %309 = dma.vmem_to_hbm [thread:$0]  %s307_s14, 128, %s600_s6, [#allocation10]   ;;  %v329_v25 = vld [vmem:[%s598_s4] ss:$0 sm:$0xff] }
 0x111   :  { %s537_s19 = smov [#allocation8]  }
 0x112   :  { %s296_s20 = sshll.u32 %s537_s19, 4  ;;  %s297_s20 = int_to_ptr.vmem [resolvable:$true] %s296_s20 }
 0x113   :  { %s501_s21 = scalar_lea.vmem %s297_s20, 128  ;;  %p506_p7 = scmp.lt.s32.totalorder %s297_s20, %s297_s20 }
 0x114   :  { %p502_p6 = scmp.ne.s32.totalorder %s297_s20, %s501_s21  ;;  %p507_p8 = scmp.lt.s32.totalorder %s501_s21, %s501_s21 }
 0x116   :  { %p508_p9 = por %p507_p8, %p506_p7 }
 0x118   :  { %p509_p10 = pnand %p508_p9, %p502_p6 }
 0x1cd   :  { %v283_v26 = vpop.f32.mrf.mxu1 }
 0x1ce   :  { %v284_v27 = vadd.f32 %v329_v25, %v283_v26 }
 0x1cf   :  { %v394_v28 = vpop.f32.mrf.mxu1 }
 0x1d0   :  { %289 = vst [vmem:[#allocation8] sm:$0xff] %v284_v27 }
 0x1d1   :  { %v286_v29 = vpop.f32.mrf.mxu1 }
 0x1d2   :  { %512 = shalt.err (!%p509_p10)
}
 0x1d3   :  { %299 = dma.vmem_to_hbm [thread:$0]  %s297_s20, 128, %s599_s5, [#allocation4]   ;;  %v395_v30 = vpop.f32.mrf.mxu1 }
 0x1d4   :  { %525 = dma.done.wait [#allocation4], 128  }
 0x1d5   :  { %526 = vsyncadd [#allocation4], 4294967168 }
 0x1d6   :  { %527 = dma.done.wait [#allocation10], 128  }
 0x1d7   :  { %528 = vsyncadd [#allocation10], 4294967168 }
 0x1d8   :  { %316 = vsyncpa [#allocation3], 1 }
 0x1d9   :  { %317 = vsyncpa [#allocation6], 1 }
 0x1da   :  { %318 = vsyncpa [#allocation4], 1 }
 0x1db   :  { %319 = vsyncpa [#allocation10], 1 }

// kernel: tpu_custom_call.1
= control target key start
LH: loop header
LB: loop body
LE: loop exit
PB: predicated region body
PF: predicated region fallthrough
CT: control target
= control target key end

     0   :  { %12 = vsyncpa [#allocation3], 0  ;;  %s594_s0 = inlined_call_operand.hbm [shape: bf16[8,128], index: 0, kind: input, shape index: {}]   ;;  %s595_s1 = inlined_call_operand.hbm [shape: bf16[128,128], index: 1, kind: input, shape index: {}]   ;;  %s596_s2 = inlined_call_operand.vmem [shape: f32[1,128], index: 2, kind: input, shape index: {}]   ;;  %s597_s3 = inlined_call_operand.hbm [shape: bf16[128,128], index: 3, kind: input, shape index: {}]   ;;  %s598_s4 = inlined_call_operand.vmem [shape: f32[1,128], index: 4, kind: input, shape index: {}]   ;;  %s599_s5 = inlined_call_operand.hbm [shape: f32[8,128], index: 5, kind: output, shape index: {0}]   ;;  %s600_s6 = inlined_call_operand.hbm [shape: f32[8,128], index: 6, kind: output, shape index: {1}]  }
   0x1   :  { %13 = vsyncpa [#allocation6], 0 }
   0x2   :  { %14 = vsyncpa [#allocation4], 0 }
   0x3   :  { %15 = vsyncpa [#allocation10], 0  ;;  %s529_s21 = smov [#allocation5]  }
   0x4   :  { %s31_s22 = sshll.u32 %s529_s21, 4  ;;  %s32_s22 = int_to_ptr.vmem [resolvable:$true] %s31_s22 }
   0x5   :  { %s429_s23 = scalar_lea.vmem %s32_s22, 1024  ;;  %p434_p1 = scmp.lt.s32.totalorder %s32_s22, %s32_s22 }
   0x6   :  { %p430_p0 = scmp.ne.s32.totalorder %s32_s22, %s429_s23  ;;  %p435_p2 = scmp.lt.s32.totalorder %s429_s23, %s429_s23 }
   0x8   :  { %p436_p3 = por %p435_p2, %p434_p1 }
   0xa   :  { %p437_p4 = pnand %p436_p3, %p430_p0 }
   0xc   :  { %440 = shalt.err (!%p437_p4)
}
   0xd   :  { %s530_s24 = smov 64   ;;  %s531_s25 = smov 4  }
   0xe   :  { %37 = dma.hbm_to_vmem [thread:$0]  %s595_s1, 1024, %s32_s22, [#allocation6], %s530_s24, %s530_s24, %s531_s25  }
   0xf   :  { %s532_s28 = smov [#allocation2]   ;;  %s533_s30 = smov [#allocation7]  }
  0x10   :  { %s22_s29 = sshll.u32 %s532_s28, 4  ;;  %s45_s7 = sshll.u32 %s533_s30, 4  ;;  %s23_s29 = int_to_ptr.vmem [resolvable:$true] %s22_s29  ;;  %s46_s7 = int_to_ptr.vmem [resolvable:$true] %s45_s7 }
  0x11   :  { %s449_s8 = scalar_lea.vmem %s23_s29, 64  ;;  %p454_p6 = scmp.lt.s32.totalorder %s23_s29, %s23_s29 }
  0x12   :  { %p450_p5 = scmp.ne.s32.totalorder %s23_s29, %s449_s8  ;;  %p455_p7 = scmp.lt.s32.totalorder %s449_s8, %s449_s8 }
  0x14   :  { %p456_p8 = por %p455_p7, %p454_p6 }
  0x16   :  { %p457_p9 = pnand %p456_p8, %p450_p5 }
  0x18   :  { %460 = shalt.err (!%p457_p9)
}
  0x19   :  { %25 = dma.hbm_to_vmem [thread:$0]  %s594_s0, 64, %s23_s29, [#allocation3]  }
  0x1a   :  { %s469_s11 = scalar_lea.vmem %s46_s7, 1024  ;;  %p474_p11 = scmp.lt.s32.totalorder %s46_s7, %s46_s7 }
  0x1b   :  { %p470_p10 = scmp.ne.s32.totalorder %s46_s7, %s469_s11  ;;  %p475_p12 = scmp.lt.s32.totalorder %s469_s11, %s469_s11 }
  0x1d   :  { %p476_p13 = por %p475_p12, %p474_p11 }
  0x1f   :  { %p477_p0 = pnand %p476_p13, %p470_p10 }
  0x21   :  { %480 = shalt.err (!%p477_p0)
}
  0x22   :  { %51 = dma.hbm_to_vmem [thread:$0]  %s597_s3, 1024, %s46_s7, [#allocation6], %s530_s24, %s530_s24, %s531_s25  }
  0x23   :  { %521 = dma.done.wait [#allocation3], 64  }
  0x24   :  { %522 = vsyncadd [#allocation3], 4294967232 }
  0x25   :  { %523 = dma.done.wait [#allocation6], 2048  }
  0x26   :  { %524 = vsyncadd [#allocation6], 4294965248  ;;  %v534_v0 = vmov 0.0   ;;  %vm535_vm0 = vmmov 0   ;;  %v405_v1 = vld [vmem:[#allocation5 + $0x38] sm:$0xff]   ;;  %v406_v2 = vld [vmem:[#allocation5 + $0x30] sm:$0xff]  }
  0x27   :  { %356 = vmatprep.subr.bf16.mxu0 %v534_v0  ;;  %372 = vmatprep.mubr.msk.bf16.mxu0 %vm535_vm0, %v534_v0  ;;  %v407_v3 = vld [vmem:[#allocation5 + $0x28] sm:$0xff]   ;;  %v413_v4 = vld [vmem:[#allocation7 + $0x38] sm:$0xff]   ;;  %v408_v5 = vld [vmem:[#allocation5 + $0x20] sm:$0xff]   ;;  %s536_s13 = smov [#allocation9]  }
  0x28   :  { %376 = vmatprep.subr.bf16.mxu1 %v534_v0  ;;  %392 = vmatprep.mubr.msk.bf16.mxu1 %vm535_vm0, %v534_v0  ;;  %v414_v6 = vld [vmem:[#allocation7 + $0x30] sm:$0xff]   ;;  %v409_v7 = vld [vmem:[#allocation5 + $0x18] sm:$0xff]   ;;  %v415_v8 = vld [vmem:[#allocation7 + $0x28] sm:$0xff]   ;;  %s306_s14 = sshll.u32 %s536_s13, 4  ;;  %s307_s14 = int_to_ptr.vmem [resolvable:$true] %s306_s14 }
  0x29   :  { %357 = vmatpush3.bf16.msra.mxu0 %v405_v1  ;;  %377 = vmatpush3.bf16.msra.mxu1 %v413_v4  ;;  %v410_v9 = vld [vmem:[#allocation5 + $0x10] sm:$0xff]   ;;  %v416_v10 = vld [vmem:[#allocation7 + $0x20] sm:$0xff]   ;;  %v411_v11 = vld [vmem:[#allocation5 + $0x8] sm:$0xff]   ;;  %s481_s15 = scalar_lea.vmem %s307_s14, 128  ;;  %p486_p2 = scmp.lt.s32.totalorder %s307_s14, %s307_s14 }
  0x2a   :  { %358 = vmatprep.subr.bf16.mxu0 %v534_v0  ;;  %378 = vmatprep.subr.bf16.mxu1 %v534_v0  ;;  %v417_v12 = vld [vmem:[#allocation7 + $0x18] sm:$0xff]   ;;  %v412_v13 = vld [vmem:[#allocation5] sm:$0xff]   ;;  %v418_v14 = vld [vmem:[#allocation7 + $0x10] sm:$0xff]   ;;  %p482_p1 = scmp.ne.s32.totalorder %s307_s14, %s481_s15  ;;  %p487_p3 = scmp.lt.s32.totalorder %s481_s15, %s481_s15 }
  0x2b   :  { %v64_v15 = vld [vmem:[#allocation2] sm:$0xf]  ;;  %v419_v16 = vld [vmem:[#allocation7 + $0x8] sm:$0xff]   ;;  %v420_v17 = vld [vmem:[#allocation7] sm:$0xff]  }
  0x2c   :  { %v320_v18 = vld [vmem:[%s596_s2] ss:$0 sm:$0xff]  ;;  %p488_p4 = por %p487_p3, %p486_p2 }
  0x2d   :  { %359 = vmatpush3.bf16.msra.mxu0 %v406_v2  ;;  %379 = vmatpush3.bf16.msra.mxu1 %v414_v6 }
  0x2e   :  { %360 = vmatprep.subr.bf16.mxu0 %v534_v0  ;;  %380 = vmatprep.subr.bf16.mxu1 %v534_v0  ;;  %p489_p5 = pnand %p488_p4, %p482_p1 }
  0x31   :  { %361 = vmatpush3.bf16.msra.mxu0 %v407_v3  ;;  %381 = vmatpush3.bf16.msra.mxu1 %v415_v8 }
  0x32   :  { %362 = vmatprep.subr.bf16.mxu0 %v534_v0  ;;  %382 = vmatprep.subr.bf16.mxu1 %v534_v0 }
  0x35   :  { %363 = vmatpush3.bf16.msra.mxu0 %v408_v5  ;;  %383 = vmatpush3.bf16.msra.mxu1 %v416_v10 }
  0x36   :  { %364 = vmatprep.subr.bf16.mxu0 %v534_v0  ;;  %384 = vmatprep.subr.bf16.mxu1 %v534_v0 }
  0x39   :  { %365 = vmatpush3.bf16.msra.mxu0 %v409_v7  ;;  %385 = vmatpush3.bf16.msra.mxu1 %v417_v12 }
  0x3a   :  { %366 = vmatprep.subr.bf16.mxu0 %v534_v0  ;;  %386 = vmatprep.subr.bf16.mxu1 %v534_v0 }
  0x3d   :  { %367 = vmatpush3.bf16.msra.mxu0 %v410_v9  ;;  %387 = vmatpush3.bf16.msra.mxu1 %v418_v14 }
  0x3e   :  { %368 = vmatprep.subr.bf16.mxu0 %v534_v0  ;;  %388 = vmatprep.subr.bf16.mxu1 %v534_v0 }
  0x41   :  { %369 = vmatpush3.bf16.msra.mxu0 %v411_v11  ;;  %389 = vmatpush3.bf16.msra.mxu1 %v419_v16 }
  0x42   :  { %370 = vmatprep.subr.bf16.mxu0 %v534_v0  ;;  %390 = vmatprep.subr.bf16.mxu1 %v534_v0 }
  0x45   :  { %371 = vmatpush3.bf16.msra.mxu0 %v412_v13  ;;  %391 = vmatpush3.bf16.msra.mxu1 %v420_v17 }
  0x48   :  { %373 = vmatmul.mubr.bf16.vlgmr.msra.gmra.mxu0 %v64_v15 }
 0x108   :  { %v170_v19 = vpop.f32.mrf.mxu0 }
 0x109   :  { %v171_v20 = vadd.f32 %v320_v18, %v170_v19 }
 0x10a   :  { %v374_v21 = vpop.f32.mrf.mxu0 }
 0x10b   :  { %v177_v22 = vpack.c.bf16 %v171_v20, %v171_v20  ;;  %176 = vst [vmem:[#allocation9] sm:$0xff] %v171_v20 }
 0x10c   :  { %v173_v23 = vpop.f32.mrf.mxu0 }
 0x10d   :  { %393 = vmatmul.mubr.bf16.vlgmr.msra.gmra.mxu1 %v177_v22 }
 0x10e   :  { %v375_v24 = vpop.f32.mrf.mxu0 }
 0x10f   :  { %492 = shalt.err (!%p489_p5)
}
 0x110   :  { %309 = dma.vmem_to_hbm [thread:$0]  %s307_s14, 128, %s600_s6, [#allocation10]   ;;  %v329_v25 = vld [vmem:[%s598_s4] ss:$0 sm:$0xff] }
 0x111   :  { %s537_s19 = smov [#allocation8]  }
 0x112   :  { %s296_s20 = sshll.u32 %s537_s19, 4  ;;  %s297_s20 = int_to_ptr.vmem [resolvable:$true] %s296_s20 }
 0x113   :  { %s501_s21 = scalar_lea.vmem %s297_s20, 128  ;;  %p506_p7 = scmp.lt.s32.totalorder %s297_s20, %s297_s20 }
 0x114   :  { %p502_p6 = scmp.ne.s32.totalorder %s297_s20, %s501_s21  ;;  %p507_p8 = scmp.lt.s32.totalorder %s501_s21, %s501_s21 }
 0x116   :  { %p508_p9 = por %p507_p8, %p506_p7 }
 0x118   :  { %p509_p10 = pnand %p508_p9, %p502_p6 }
 0x1cd   :  { %v283_v26 = vpop.f32.mrf.mxu1 }
 0x1ce   :  { %v284_v27 = vadd.f32 %v329_v25, %v283_v26 }
 0x1cf   :  { %v394_v28 = vpop.f32.mrf.mxu1 }
 0x1d0   :  { %289 = vst [vmem:[#allocation8] sm:$0xff] %v284_v27 }
 0x1d1   :  { %v286_v29 = vpop.f32.mrf.mxu1 }
 0x1d2   :  { %512 = shalt.err (!%p509_p10)
}
 0x1d3   :  { %299 = dma.vmem_to_hbm [thread:$0]  %s297_s20, 128, %s599_s5, [#allocation4]   ;;  %v395_v30 = vpop.f32.mrf.mxu1 }
 0x1d4   :  { %525 = dma.done.wait [#allocation4], 128  }
 0x1d5   :  { %526 = vsyncadd [#allocation4], 4294967168 }
 0x1d6   :  { %527 = dma.done.wait [#allocation10], 128  }
 0x1d7   :  { %528 = vsyncadd [#allocation10], 4294967168 }
 0x1d8   :  { %316 = vsyncpa [#allocation3], 1 }
 0x1d9   :  { %317 = vsyncpa [#allocation6], 1 }
 0x1da   :  { %318 = vsyncpa [#allocation4], 1 }
 0x1db   :  { %319 = vsyncpa [#allocation10], 1 }

</bundles_post_ra>
